<compile_context>
chip_gen: v7x
topology: tpu7x:2x2x1
jax: 0.10.0
libtpu: 0.0.40
codegen_flags: <defaults>
</compile_context>

<pallas_src>
import functools

import jax
import jax.numpy as jnp
from jax.experimental import pallas as pl
from jax.experimental.pallas import tpu as pltpu


# ---------------- fused GCN kernel ----------------
def _gcn_kernel(h_ref, g_ref, w_ref, b_ref, out_ref, acc_ref, *, act):
    # h_ref: [tm, tk]   g_ref: [tk, n]   w_ref: [n, out_dim]   b_ref: [1, out_dim]
    # acc_ref (VMEM scratch): [tm, n] f32, persists across the k grid axis.
    k = pl.program_id(1)

    @pl.when(k == 0)
    def _():
        acc_ref[...] = jnp.zeros_like(acc_ref)

    # Neighborhood aggregation: acc += h_tile @ g_tile  (MXU, f32 accumulate)
    acc_ref[...] += jnp.dot(h_ref[...], g_ref[...],
                            preferred_element_type=jnp.float32)

    @pl.when(k == pl.num_programs(1) - 1)
    def _():
        # Projection + bias + activation, fused on the final contraction step.
        z = jnp.dot(acc_ref[...], w_ref[...],
                    preferred_element_type=jnp.float32) + b_ref[...]
        out_ref[...] = act(z).astype(out_ref.dtype)


def _pick_tile(dim, pref, quantum):
    """Largest tile <= pref that divides dim and is a multiple of `quantum`;
    falls back to the full dim (always a legal BlockSpec block)."""
    if dim <= pref:
        return dim
    t = pref - (pref % quantum)
    while t >= quantum:
        if dim % t == 0:
            return t
        t -= quantum
    return dim


def gcn_forward(g, h, proj_w, proj_b, *, act=jax.nn.relu, p=0.0):
    """act((drop(h) @ g) @ proj_w + proj_b).  proj_w is nn.Linear weight^T: [in_dim, out_dim]."""
    # TODO(synk): nn.Dropout with p > 0 is a train-time stochastic op (needs PRNG
    # plumbing); only the p == 0 -> nn.Identity path is implemented here.
    assert p == 0.0, "only the p == 0 (Identity) path is implemented"

    m, kdim = h.shape
    kdim2, n = g.shape
    assert kdim == kdim2, "torch.matmul(h, g) requires h.shape[-1] == g.shape[0]"
    n2, out_dim = proj_w.shape
    assert n2 == n, "nn.Linear(in_dim, out_dim) requires in_dim == g.shape[1]"
    b_row = proj_b.reshape(1, out_dim)  # lane-dense bias row

    tm = _pick_tile(m, 256, 8)        # sublane quantum for the row tile
    tk = _pick_tile(kdim, 512, 128)   # lane quantum (h's last dim) / sublane for g

    kernel = functools.partial(_gcn_kernel, act=act)
    return pl.pallas_call(
        kernel,
        out_shape=jax.ShapeDtypeStruct((m, out_dim), h.dtype),
        grid_spec=pltpu.PrefetchScalarGridSpec(
            num_scalar_prefetch=0,
            grid=(m // tm, kdim // tk),
            in_specs=[
                pl.BlockSpec((tm, tk), lambda i, k: (i, k)),       # h row/K tile
                pl.BlockSpec((tk, n), lambda i, k: (k, 0)),        # g K-slab (all cols)
                pl.BlockSpec((n, out_dim), lambda i, k: (0, 0)),   # proj weight, resident
                pl.BlockSpec((1, out_dim), lambda i, k: (0, 0)),   # bias, lane-dense row
            ],
            out_specs=pl.BlockSpec((tm, out_dim), lambda i, k: (i, 0)),
            scratch_shapes=[pltpu.VMEM((tm, n), jnp.float32)],     # h@g accumulator
        ),
        compiler_params=pltpu.CompilerParams(
            dimension_semantics=("parallel", "arbitrary"),
        ),
    )(h, g, proj_w, b_row)


if __name__ == "__main__":
    key = jax.random.PRNGKey(0)
    n = 16        # nodes -> g is [n, n]; nn.Linear in_dim = n (matmul(h, g) output dim)
    m = 8         # rows of h (h @ g requires h.shape[-1] == n)
    out_dim = 32  # nn.Linear out_dim

    kg, kh, kw, kb = jax.random.split(key, 4)
    adj = (jax.random.uniform(kg, (n, n)) < 0.3).astype(jnp.float32)
    adj = jnp.maximum(adj, jnp.eye(n, dtype=jnp.float32))      # self-loops
    g = adj / jnp.sum(adj, axis=1, keepdims=True)              # normalized adjacency
    h = jax.random.normal(kh, (m, n), dtype=jnp.float32)

    # nn.Linear(n, out_dim): weight [out_dim, n] -> stored transposed as [n, out_dim]
    proj_w = jax.random.normal(kw, (n, out_dim), dtype=jnp.float32) / jnp.sqrt(n)
    proj_b = jax.random.normal(kb, (out_dim,), dtype=jnp.float32) * 0.1

    out = gcn_forward(g, h, proj_w, proj_b, act=jax.nn.relu, p=0.0)
    jax.block_until_ready(out)

    ref = jax.nn.relu(jnp.matmul(jnp.matmul(h, g), proj_w) + proj_b[None, :])
    assert out.shape == (m, out_dim)
    assert jnp.allclose(out, ref, rtol=2e-2, atol=2e-2)
    print("KERNEL_OK")
</pallas_src>

<mosaic_0001>
module attributes {stable_mosaic.version = 11 : i64} {
  func.func @_gcn_kernel(%arg0: i32, %arg1: i32, %arg2: memref<8x16xf32, #tpu.memory_space<vmem>>, %arg3: memref<16x16xf32, #tpu.memory_space<vmem>>, %arg4: memref<16x32xf32, #tpu.memory_space<vmem>>, %arg5: memref<1x32xf32, #tpu.memory_space<vmem>>, %arg6: memref<8x32xf32, #tpu.memory_space<vmem>>, %arg7: memref<8x16xf32, #tpu.memory_space<vmem>>) attributes {dimension_semantics = [#tpu.dimension_semantics<parallel>, #tpu.dimension_semantics<arbitrary>], iteration_bounds = array<i64: 1, 1>, scalar_prefetch = 0 : i64, scratch_operands = 1 : i64, tpu.core_type = #tpu.core_type<tc>, window_params = [{transform_indices = @transform_0, window_bounds = array<i64: 8, 16>}, {transform_indices = @transform_1, window_bounds = array<i64: 16, 16>}, {pipeline_mode = #tpu.pipeline_mode<synchronous>, transform_indices = @transform_2, window_bounds = array<i64: 16, 32>}, {pipeline_mode = #tpu.pipeline_mode<synchronous>, transform_indices = @transform_3, window_bounds = array<i64: 1, 32>}, {transform_indices = @transform_4, window_bounds = array<i64: 8, 32>}]} {
    %c0_i32 = arith.constant 0 : i32
    %0 = arith.cmpi eq, %arg1, %c0_i32 : i32
    %1 = arith.extui %0 : i1 to i32
    %c0_i32_0 = arith.constant 0 : i32
    %2 = arith.cmpi ne, %1, %c0_i32_0 : i32
    scf.if %2 {
      %cst_10 = arith.constant 0.000000e+00 : f32
      %12 = vector.broadcast %cst_10 : f32 to vector<8x16xf32>
      %c0_11 = arith.constant 0 : index
      %c0_12 = arith.constant 0 : index
      %13 = vector.load %arg7[%c0_11, %c0_12] : memref<8x16xf32, #tpu.memory_space<vmem>>, vector<8x16xf32>
      tpu.vector_store %arg7[%c0_11, %c0_12], %12 {strides = array<i32>} : memref<8x16xf32, #tpu.memory_space<vmem>>, vector<8x16xf32>,
    } else {
    }
    %c0 = arith.constant 0 : index
    %c0_1 = arith.constant 0 : index
    %3 = vector.load %arg7[%c0, %c0_1] : memref<8x16xf32, #tpu.memory_space<vmem>>, vector<8x16xf32>
    %c0_2 = arith.constant 0 : index
    %c0_3 = arith.constant 0 : index
    %4 = vector.load %arg2[%c0_2, %c0_3] : memref<8x16xf32, #tpu.memory_space<vmem>>, vector<8x16xf32>
    %c0_4 = arith.constant 0 : index
    %c0_5 = arith.constant 0 : index
    %5 = vector.load %arg3[%c0_4, %c0_5] : memref<16x16xf32, #tpu.memory_space<vmem>>, vector<16x16xf32>
    %cst = arith.constant dense<0.000000e+00> : vector<8x16xf32>
    %6 = tpu.matmul %4, %5, %cst {dimension_numbers = #tpu.dot_dimension_numbers<[1], [0], [0], [1], [0, 0, 1, 1], [], []>} : vector<8x16xf32>, vector<16x16xf32>, vector<8x16xf32> -> vector<8x16xf32>
    %7 = arith.addf %3, %6 : vector<8x16xf32>
    %c0_6 = arith.constant 0 : index
    %c0_7 = arith.constant 0 : index
    %8 = vector.load %arg7[%c0_6, %c0_7] : memref<8x16xf32, #tpu.memory_space<vmem>>, vector<8x16xf32>
    tpu.vector_store %arg7[%c0_6, %c0_7], %7 {strides = array<i32>} : memref<8x16xf32, #tpu.memory_space<vmem>>, vector<8x16xf32>,
    %c0_i32_8 = arith.constant 0 : i32
    %9 = arith.cmpi eq, %arg1, %c0_i32_8 : i32
    %10 = arith.extui %9 : i1 to i32
    %c0_i32_9 = arith.constant 0 : i32
    %11 = arith.cmpi ne, %10, %c0_i32_9 : i32
    scf.if %11 {
      %c0_10 = arith.constant 0 : index
      %c0_11 = arith.constant 0 : index
      %12 = vector.load %arg7[%c0_10, %c0_11] : memref<8x16xf32, #tpu.memory_space<vmem>>, vector<8x16xf32>
      %c0_12 = arith.constant 0 : index
      %c0_13 = arith.constant 0 : index
      %13 = vector.load %arg4[%c0_12, %c0_13] : memref<16x32xf32, #tpu.memory_space<vmem>>, vector<16x32xf32>
      %cst_14 = arith.constant dense<0.000000e+00> : vector<8x32xf32>
      %14 = tpu.matmul %12, %13, %cst_14 {dimension_numbers = #tpu.dot_dimension_numbers<[1], [0], [0], [1], [0, 0, 1, 1], [], []>} : vector<8x16xf32>, vector<16x32xf32>, vector<8x32xf32> -> vector<8x32xf32>
      %c0_15 = arith.constant 0 : index
      %c0_16 = arith.constant 0 : index
      %15 = vector.load %arg5[%c0_15, %c0_16] : memref<1x32xf32, #tpu.memory_space<vmem>>, vector<1x32xf32>
      %16 = vector.broadcast %15 : vector<1x32xf32> to vector<8x32xf32>
      %17 = arith.addf %14, %16 : vector<8x32xf32>
      %cst_17 = arith.constant 0.000000e+00 : f32
      %18 = vector.broadcast %cst_17 : f32 to vector<8x32xf32>
      %19 = arith.maximumf %17, %18 : vector<8x32xf32>
      %c0_18 = arith.constant 0 : index
      %c0_19 = arith.constant 0 : index
      %20 = vector.load %arg6[%c0_18, %c0_19] : memref<8x32xf32, #tpu.memory_space<vmem>>, vector<8x32xf32>
      tpu.vector_store %arg6[%c0_18, %c0_19], %19 {strides = array<i32>} : memref<8x32xf32, #tpu.memory_space<vmem>>, vector<8x32xf32>,
    } else {
    }
    return
  }
  func.func @transform_0(%arg0: i32, %arg1: i32) -> (i32, i32) {
    %c0_i32 = arith.constant 0 : i32
    return %arg0, %arg1 : i32, i32
  }
  func.func @transform_1(%arg0: i32, %arg1: i32) -> (i32, i32) {
    %c0_i32 = arith.constant 0 : i32
    %c0_i32_0 = arith.constant 0 : i32
    return %arg1, %c0_i32 : i32, i32
  }
  func.func @transform_2(%arg0: i32, %arg1: i32) -> (i32, i32) {
    %c0_i32 = arith.constant 0 : i32
    %c0_i32_0 = arith.constant 0 : i32
    %c0_i32_1 = arith.constant 0 : i32
    return %c0_i32, %c0_i32_0 : i32, i32
  }
  func.func @transform_3(%arg0: i32, %arg1: i32) -> (i32, i32) {
    %c0_i32 = arith.constant 0 : i32
    %c0_i32_0 = arith.constant 0 : i32
    %c0_i32_1 = arith.constant 0 : i32
    return %c0_i32, %c0_i32_0 : i32, i32
  }
  func.func @transform_4(%arg0: i32, %arg1: i32) -> (i32, i32) {
    %c0_i32 = arith.constant 0 : i32
    %c0_i32_0 = arith.constant 0 : i32
    return %arg0, %c0_i32 : i32, i32
  }
}

</mosaic_0001>

<bundles_post_ra>
// kernel: tpu_custom_call.1
= control target key start
LH: loop header
LB: loop body
LE: loop exit
PB: predicated region body
PF: predicated region fallthrough
CT: control target
= control target key end

     0   :  { %9 = vsyncpa [#allocation4], 0  ;;  %s475_s0 = inlined_call_operand.hbm [shape: f32[8,16], index: 0, kind: input, shape index: {}]   ;;  %s476_s1 = inlined_call_operand.hbm [shape: f32[16,16], index: 1, kind: input, shape index: {}]   ;;  %s477_s2 = inlined_call_operand.hbm [shape: f32[16,32], index: 2, kind: input, shape index: {}]   ;;  %s478_s3 = inlined_call_operand.vmem [shape: f32[1,32], index: 3, kind: input, shape index: {}]   ;;  %s479_s4 = inlined_call_operand.hbm [shape: f32[8,32], index: 4, kind: output, shape index: {}]  }
   0x1   :  { %10 = vsyncpa [#allocation7], 0 }
   0x2   :  { %11 = vsyncpa [#allocation5], 0  ;;  %s380_s15 = smov [#allocation6]   ;;  %s286_s19 = scalar_lea.hbm %s476_s1, 256 }
   0x3   :  { %s27_s16 = sshll.u32 %s380_s15, 4  ;;  %p287_p0 = scmp.ne.s32.totalorder %s476_s1, %s286_s19  ;;  %s28_s16 = int_to_ptr.vmem [resolvable:$true] %s27_s16 }
   0x4   :  { %p290_p1 = scmp.lt.u32.totalorder %s286_s19, %s476_s1 }
   0x6   :  { %p292_p2 = pnand %p290_p1, %p287_p0 }
   0x8   :  { %295 = shalt.err (!%p292_p2)
}
   0x9   :  { %s296_s24 = scalar_lea.vmem %s28_s16, 256  ;;  %p301_p4 = scmp.lt.s32.totalorder %s28_s16, %s28_s16 }
   0xa   :  { %p297_p3 = scmp.ne.s32.totalorder %s28_s16, %s296_s24  ;;  %p302_p5 = scmp.lt.s32.totalorder %s296_s24, %s296_s24 }
   0xc   :  { %p303_p6 = por %p302_p5, %p301_p4 }
   0xe   :  { %p304_p7 = pnand %p303_p6, %p297_p3 }
  0x10   :  { %307 = shalt.err (!%p304_p7)
}
  0x11   :  { %s381_s25 = smov 128   ;;  %s382_s26 = smov 8  }
  0x12   :  { %33 = dma.hbm_to_vmem [thread:$0]  %s476_s1, 256, %s28_s16, [#allocation7], %s381_s25, %s381_s25, %s382_s26  }
  0x13   :  { %s383_s29 = smov [#allocation3]   ;;  %s384_s5 = smov [#allocation8]  }
  0x14   :  { %s18_s30 = sshll.u32 %s383_s29, 4  ;;  %s39_s6 = sshll.u32 %s384_s5, 4  ;;  %s19_s30 = int_to_ptr.vmem [resolvable:$true] %s18_s30  ;;  %s40_s6 = int_to_ptr.vmem [resolvable:$true] %s39_s6 }
  0x15   :  { %s308_s9 = scalar_lea.hbm %s475_s0, 128 }
  0x16   :  { %p309_p8 = scmp.ne.s32.totalorder %s475_s0, %s308_s9  ;;  %p312_p9 = scmp.lt.u32.totalorder %s308_s9, %s475_s0 }
  0x18   :  { %p314_p10 = pnand %p312_p9, %p309_p8 }
  0x1a   :  { %317 = shalt.err (!%p314_p10)
}
  0x1b   :  { %s318_s1 = scalar_lea.vmem %s19_s30, 128  ;;  %p323_p12 = scmp.lt.s32.totalorder %s19_s30, %s19_s30 }
  0x1c   :  { %p319_p11 = scmp.ne.s32.totalorder %s19_s30, %s318_s1  ;;  %p324_p13 = scmp.lt.s32.totalorder %s318_s1, %s318_s1 }
  0x1e   :  { %p325_p0 = por %p324_p13, %p323_p12 }
  0x20   :  { %p326_p1 = pnand %p325_p0, %p319_p11 }
  0x22   :  { %329 = shalt.err (!%p326_p1)
}
  0x23   :  { %21 = dma.hbm_to_vmem [thread:$0]  %s475_s0, 128, %s19_s30, [#allocation4]  }
  0x24   :  { %s330_s18 = scalar_lea.hbm %s477_s2, 256 }
  0x25   :  { %p331_p2 = scmp.ne.s32.totalorder %s477_s2, %s330_s18  ;;  %p334_p3 = scmp.lt.u32.totalorder %s330_s18, %s477_s2 }
  0x27   :  { %p336_p4 = pnand %p334_p3, %p331_p2 }
  0x29   :  { %339 = shalt.err (!%p336_p4)
}
  0x2a   :  { %s340_s23 = scalar_lea.vmem %s40_s6, 256  ;;  %p345_p6 = scmp.lt.s32.totalorder %s40_s6, %s40_s6 }
  0x2b   :  { %p341_p5 = scmp.ne.s32.totalorder %s40_s6, %s340_s23  ;;  %p346_p7 = scmp.lt.s32.totalorder %s340_s23, %s340_s23 }
  0x2d   :  { %p347_p8 = por %p346_p7, %p345_p6 }
  0x2f   :  { %p348_p9 = pnand %p347_p8, %p341_p5 }
  0x31   :  { %351 = shalt.err (!%p348_p9)
}
  0x32   :  { %45 = dma.hbm_to_vmem [thread:$0]  %s477_s2, 256, %s40_s6, [#allocation7], %s381_s25, %s381_s25, %s382_s26  }
  0x33   :  { %374 = dma.done.wait [#allocation4], 128  }
  0x34   :  { %375 = vsyncadd [#allocation4], 4294967168 }
  0x35   :  { %376 = dma.done.wait [#allocation7], 512  }
  0x36   :  { %377 = vsyncadd [#allocation7], 4294966784  ;;  %vm61_vm0 = vcmask 130048   ;;  %v385_v0 = vmov 0.0|0.0   ;;  %vm386_vm1 = vmmov 0   ;;  %v387_v1 = vmov 0.0  }
  0x37   :  { %271 = vmatprep.subr.bf16.mxu0 %v385_v0  ;;  %261 = vmatprep.mubr.msk.f32.mxu0 %vm386_vm1, %v387_v1  ;;  %62 = vst.msk [vmem:[#allocation2] sm:$0xff] %vm61_vm0, %v387_v1  ;;  %v65_v2 = vld [vmem:[#allocation6] sm:$0xff]  ;;  %v66_v3 = vld [vmem:[#allocation6 + $0x8] sm:$0xff]  ;;  %v64_v5 = vld [vmem:[#allocation3] sm:$0xff]  ;;  %s388_s26 = smov [#allocation9]   ;;  %vm230_vm2 = vcmask 261120  }
  0x38   :  { %274 = vmatprep.subr.bf16.mxu1 %v385_v0  ;;  %268 = vmatprep.mubr.msk.f32.mxu1 %vm386_vm1, %v387_v1  ;;  %v272_v4 = vpack.c.bf16 %v66_v3, %v65_v2  ;;  %v147_v6 = vld [vmem:[#allocation8] sm:$0xff]  ;;  %v148_v7 = vld [vmem:[#allocation8 + $0x8] sm:$0xff]  ;;  %s238_s27 = sshll.u32 %s388_s26, 4  ;;  %s239_s27 = int_to_ptr.vmem [resolvable:$true] %s238_s27 }
  0x39   :  { %v275_v8 = vpack.c.bf16 %v148_v7, %v147_v6  ;;  %v249_v14 = vld [vmem:[%s478_s3] ss:$0 sm:$0xff]  ;;  %s352_s28 = scalar_lea.vmem %s239_s27, 128  ;;  %p357_p11 = scmp.lt.s32.totalorder %s239_s27, %s239_s27 }
  0x3a   :  { %273 = vmatpush3.bf16.msra.mxu0 %v272_v4  ;;  %p353_p10 = scmp.ne.s32.totalorder %s239_s27, %s352_s28  ;;  %p358_p12 = scmp.lt.s32.totalorder %s352_s28, %s352_s28 }
  0x3b   :  { %276 = vmatpush3.bf16.msra.mxu1 %v275_v8 }
  0x3c   :  { %p359_p13 = por %p358_p12, %p357_p11 }
  0x3d   :  { %262 = vmatmul.mubr.msk.f32.vlgmr.msra.gmra.mrb[0].mxu0 %vm61_vm0, %v64_v5 }
  0x3e   :  { %v63_v9 = vld [vmem:[#allocation2] sm:$0xff]  ;;  %p360_p0 = pnand %p359_p13, %p353_p10 }
 0x110   :  { %v137_v10 = vpop.f32.mrb[0].mxu0 }
 0x111   :  { %v141_v11 = vadd.f32 %v137_v10, %v63_v9  ;;  %v263_v12 = vpop.f32.mrb[1].mxu0 }
 0x113   :  { %142 = vst.msk [vmem:[#allocation2] sm:$0xff] %vm61_vm0, %v141_v11 }
 0x11a   :  { %v146_v13 = vld [vmem:[#allocation2] sm:$0xff] }
 0x11b   :  { %269 = vmatmul.mubr.msk.f32.vlgmr.msra.gmra.mrb[0].mxu1 %vm61_vm0, %v146_v13 }
 0x1ee   :  { %v225_v15 = vpop.f32.mrb[0].mxu1 }
 0x1ef   :  { %v226_v16 = vadd.f32 %v249_v14, %v225_v15  ;;  %v270_v17 = vpop.f32.mrb[1].mxu1 }
 0x1f1   :  { %v229_v18 = vmax.f32 %v226_v16, 0.0 }
 0x1f3   :  { %231 = vst.msk [vmem:[#allocation9] sm:$0xff] %vm230_vm2, %v229_v18 }
 0x1f4   :  { %363 = shalt.err (!%p360_p0)
}
 0x1f5   :  { %s364_s3 = scalar_lea.hbm %s479_s4, 128 }
 0x1f6   :  { %p365_p1 = scmp.ne.s32.totalorder %s479_s4, %s364_s3  ;;  %p368_p2 = scmp.lt.u32.totalorder %s364_s3, %s479_s4 }
 0x1f8   :  { %p370_p3 = pnand %p368_p2, %p365_p1 }
 0x1fa   :  { %373 = shalt.err (!%p370_p3)
}
 0x1fb   :  { %241 = dma.vmem_to_hbm [thread:$0]  %s239_s27, 128, %s479_s4, [#allocation5]  }
 0x1fc   :  { %378 = dma.done.wait [#allocation5], 128  }
 0x1fd   :  { %379 = vsyncadd [#allocation5], 4294967168 }
 0x1fe   :  { %245 = vsyncpa [#allocation4], 1 }
 0x1ff   :  { %246 = vsyncpa [#allocation7], 1 }
 0x200   :  { %247 = vsyncpa [#allocation5], 1 }

</bundles_post_ra>
